<compile_context>
chip_gen: v7x
topology: tpu7x:2x2x1
jax: 0.10.0
libtpu: 0.0.40
codegen_flags: <defaults>
</compile_context>

<pallas_src>
import functools

import jax
import jax.numpy as jnp
from jax.experimental import pallas as pl
from jax.experimental.pallas import tpu as pltpu


def _matching_accuracy_kernel(resp_ref, loc_ref, out_ref, *,
                              width, hw, total_rows, block_rows,
                              thresholds_sq, shift, use_packed_argmax):
    """One grid step = `block_rows` collapsed (batch*sampling) rows.

    resp_ref: (Rt, HW)    VMEM, native dtype -- flattened response maps
    loc_ref : (Rt, 2)     f32 VMEM           -- per-row (x, y) source locations
    out_ref : (1, 8, 128) f32 VMEM           -- partial counts; sublane r broadcasts count r
    """
    resp = resp_ref[...]                                        # (Rt, HW)

    if use_packed_argmax:
        # 16-bit float input: fuse value-max and argmax into a SINGLE
        # cross-lane reduction.  Build an int32 key whose upper 16 bits are a
        # monotone (in float value) remap of the raw bits and whose lower 16
        # bits hold the reversed index, then take one jnp.max.
        bits = pltpu.bitcast(resp, jnp.int16).astype(jnp.int32)  # sign-extended
        key = jnp.where(bits >= 0, bits, -(bits + 32769))        # monotone in value
        idx = jax.lax.broadcasted_iota(jnp.int32, resp.shape, 1)
        packed = (key << 16) | (hw - 1 - idx)
        best = jnp.max(packed, axis=1, keepdims=True)            # (Rt, 1)
        amax = (hw - 1) - (best & 0xFFFF)                        # first-max index
    else:
        # f32 path: value max + first-occurrence index via masked min.
        m = jnp.max(resp, axis=1, keepdims=True)                 # (Rt, 1)
        idx = jax.lax.broadcasted_iota(jnp.int32, resp.shape, 1)
        masked_idx = jnp.where(resp == m, idx, hw)
        amax = jnp.min(masked_idx, axis=1, keepdims=True)        # (Rt, 1) int32

    if shift is not None:
        # W is a power of two: cheap integer decode of (x, y).
        det_x = (amax & (width - 1)).astype(jnp.float32)
        det_y = (amax >> shift).astype(jnp.float32)
    else:
        af = amax.astype(jnp.float32)
        det_x = jnp.mod(af, jnp.float32(width))
        det_y = jnp.floor(af / jnp.float32(width))

    loc = loc_ref[...]                                           # (Rt, 2) f32
    dx = det_x - loc[:, 0:1]
    dy = det_y - loc[:, 1:2]
    d2 = dx * dx + dy * dy                                       # (Rt, 1) squared distance

    # Tail mask: only rows with a global index < total_rows contribute
    # (blocks are cdiv-tiled, the last block may be ragged / padded).
    row0 = pl.program_id(0) * block_rows
    rid = row0 + jax.lax.broadcasted_iota(jnp.int32, d2.shape, 0)
    valid = (rid < total_rows).astype(jnp.float32)

    t1_sq, t2_sq, t3_sq = thresholds_sq
    c1 = jnp.sum((d2 < t1_sq).astype(jnp.float32) * valid)
    c2 = jnp.sum((d2 < t2_sq).astype(jnp.float32) * valid)
    c3 = jnp.sum((d2 < t3_sq).astype(jnp.float32) * valid)

    # Lane-dense output tile: sublane 0 -> c1, 1 -> c2, 2 -> c3 (broadcast
    # across 128 lanes), remaining sublanes zero.  Unmasked full-width store.
    sub = jax.lax.broadcasted_iota(jnp.int32, (8, 128), 0)
    tile = jnp.where(sub == 0, c1,
           jnp.where(sub == 1, c2,
           jnp.where(sub == 2, c3, jnp.float32(0.0))))
    out_ref[0] = tile


def matching_accuracy_metric(response_map, source_feature_2d_locations,
                             boundaries, threshold):
    """Pallas implementation of MatchingAccuracyMetric.forward.

    `boundaries` is accepted (like the PyTorch module) but unused.
    Returns (ratio_1, ratio_2, ratio_3) as f32 scalars.
    """
    del boundaries  # unused in the reference forward pass
    B, S, H, W = response_map.shape
    HW = H * W
    R = B * S

    # Collapse (B, S) -> rows; free reshapes, native dtype for the big read.
    resp_flat = response_map.reshape(R, HW)
    loc = source_feature_2d_locations.astype(jnp.float32).reshape(R, 2)

    itemsize = resp_flat.dtype.itemsize
    # Row alignment = sublane packing for the dtype -> dense (8/16/32, 128) tiles.
    row_align = max(8, 32 // max(1, itemsize))
    r_pad = pl.cdiv(R, row_align) * row_align
    if r_pad != R:
        resp_flat = jnp.pad(resp_flat, ((0, r_pad - R), (0, 0)))
        loc = jnp.pad(loc, ((0, r_pad - R), (0, 0)))

    # Block size: as many rows as fit in ~4 MiB (so a double-buffered block is
    # well inside the default scoped-VMEM limit on v5e/v6e/v7x), but split
    # into >= 2 blocks whenever possible so both v7x TensorCores get work.
    row_bytes = HW * itemsize
    target_block_bytes = 4 * 1024 * 1024
    rows_cap = max(row_align,
                   (target_block_bytes // max(1, row_bytes)) // row_align * row_align)
    half_rows = pl.cdiv(pl.cdiv(r_pad, 2), row_align) * row_align
    rt = int(min(rows_cap, max(row_align, half_rows)))
    num_blocks = pl.cdiv(r_pad, rt)

    compiler_kwargs = {"dimension_semantics": ("parallel",)}
    vmem_needed = 2 * (rt * row_bytes + rt * 2 * 4 + 8 * 128 * 4)
    if vmem_needed > 12 * 1024 * 1024:
        # Minimum-size block is forced above the default scoped limit (huge
        # H*W): raise the limit explicitly, capped for v7x's 64 MiB VMEM.
        compiler_kwargs["vmem_limit_bytes"] = int(
            min(vmem_needed + (4 << 20), 48 * 1024 * 1024))

    shift = None
    if W & (W - 1) == 0:
        shift = int(W).bit_length() - 1

    t = float(threshold)
    thresholds_sq = (t * t, (2.0 * t) ** 2, (4.0 * t) ** 2)

    use_packed = bool(jnp.issubdtype(resp_flat.dtype, jnp.floating)
                      and itemsize == 2 and HW <= (1 << 16))

    kernel = functools.partial(
        _matching_accuracy_kernel, width=W, hw=HW, total_rows=R,
        block_rows=rt, thresholds_sq=thresholds_sq, shift=shift,
        use_packed_argmax=use_packed)

    cost = pl.CostEstimate(
        flops=6 * R * HW + 24 * R,
        transcendentals=0,
        bytes_accessed=R * HW * itemsize + R * 2 * 4 + num_blocks * 8 * 128 * 4)

    partials = pl.pallas_call(
        kernel,
        out_shape=jax.ShapeDtypeStruct((num_blocks, 8, 128), jnp.float32),
        grid=(num_blocks,),
        in_specs=[
            pl.BlockSpec((rt, HW), lambda b: (b, 0)),
            pl.BlockSpec((rt, 2), lambda b: (b, 0)),
        ],
        out_specs=pl.BlockSpec((1, 8, 128), lambda b: (b, 0, 0)),
        compiler_params=pltpu.CompilerParams(**compiler_kwargs),
        cost_estimate=cost,
    )(resp_flat, loc)

    counts = jnp.sum(partials, axis=0)        # (8, 128); sublane r, lane 0 = count r
    denom = jnp.float32(B * S)
    return counts[0, 0] / denom, counts[1, 0] / denom, counts[2, 0] / denom


def _reference(response_map, src, threshold):
    """Pure-JAX reference (mirrors the PyTorch code) for verification."""
    B, S, H, W = response_map.shape
    flat = response_map.reshape(B, S, H * W)
    idx = jnp.argmax(flat, axis=2).astype(jnp.float32)              # (B, S)
    det = jnp.stack([jnp.mod(idx, W), jnp.floor(idx / W)], axis=2)  # (B, S, 2)
    dist = jnp.linalg.norm(det - src, axis=2)                       # (B, S)
    n = B * S
    r1 = jnp.sum((dist < threshold).astype(jnp.float32)) / n
    r2 = jnp.sum((dist < 2.0 * threshold).astype(jnp.float32)) / n
    r3 = jnp.sum((dist < 4.0 * threshold).astype(jnp.float32)) / n
    return r1, r2, r3


if __name__ == "__main__":
    # Deterministic "parameter": the module's only init arg.
    threshold = 2.0

    B, S, H, W = 2, 8, 16, 16
    key = jax.random.PRNGKey(0)
    k1, k2 = jax.random.split(key)

    response_map = jax.random.normal(k1, (B, S, H, W), dtype=jnp.float32)
    source_feature_2d_locations = jax.random.uniform(
        k2, (B, S, 2), dtype=jnp.float32, minval=0.0, maxval=float(W - 1))
    boundaries = jnp.ones((B, 1, H, W), dtype=jnp.float32)  # unused, as in torch

    r1, r2, r3 = matching_accuracy_metric(
        response_map, source_feature_2d_locations, boundaries, threshold)
    jax.block_until_ready((r1, r2, r3))

    e1, e2, e3 = _reference(response_map, source_feature_2d_locations, threshold)
    assert abs(float(r1) - float(e1)) < 1e-6
    assert abs(float(r2) - float(e2)) < 1e-6
    assert abs(float(r3) - float(e3)) < 1e-6

    print("KERNEL_OK")
</pallas_src>

<mosaic_0001>
module attributes {stable_mosaic.version = 11 : i64} {
  func.func @_matching_accuracy_kernel(%arg0: i32, %arg1: memref<8x256xf32, #tpu.memory_space<vmem>>, %arg2: memref<8x2xf32, #tpu.memory_space<vmem>>, %arg3: memref<1x8x128xf32, #tpu.memory_space<vmem>>) attributes {dimension_semantics = [#tpu.dimension_semantics<parallel>], iteration_bounds = array<i64: 2>, scalar_prefetch = 0 : i64, scratch_operands = 0 : i64, tpu.core_type = #tpu.core_type<tc>, window_params = [{transform_indices = @transform_0, window_bounds = array<i64: 8, 256>}, {transform_indices = @transform_1, window_bounds = array<i64: 8, 2>}, {transform_indices = @transform_2, window_bounds = array<i64: 1, 8, 128>}]} {
    %c0 = arith.constant 0 : index
    %c0_0 = arith.constant 0 : index
    %0 = vector.load %arg1[%c0, %c0_0] : memref<8x256xf32, #tpu.memory_space<vmem>>, vector<8x256xf32>
    %cst = arith.constant dense<0xFF800000> : vector<8xf32>
    %1 = vector.multi_reduction <maximumf>, %0, %cst [1] : vector<8x256xf32> to vector<8xf32>
    %2 = vector.shape_cast %1 : vector<8xf32> to vector<8x1xf32>
    %3 = tpu.iota {dimensions = array<i32: 1>} : vector<8x256xi32>
    %4 = vector.broadcast %2 : vector<8x1xf32> to vector<8x256xf32>
    %5 = arith.cmpf oeq, %0, %4 : vector<8x256xf32>
    %c256_i32 = arith.constant 256 : i32
    %6 = vector.broadcast %c256_i32 : i32 to vector<8x256xi32>
    %7 = arith.select %5, %3, %6 : vector<8x256xi1>, vector<8x256xi32>
    %cst_1 = arith.constant dense<2147483647> : vector<8xi32>
    %8 = vector.multi_reduction <minsi>, %7, %cst_1 [1] : vector<8x256xi32> to vector<8xi32>
    %9 = vector.shape_cast %8 : vector<8xi32> to vector<8x1xi32>
    %c15_i32 = arith.constant 15 : i32
    %10 = vector.broadcast %c15_i32 : i32 to vector<8x1xi32>
    %11 = arith.andi %9, %10 : vector<8x1xi32>
    %12 = arith.sitofp %11 : vector<8x1xi32> to vector<8x1xf32>
    %c4_i32 = arith.constant 4 : i32
    %13 = vector.broadcast %c4_i32 : i32 to vector<8x1xi32>
    %14 = arith.shrsi %9, %13 : vector<8x1xi32>
    %15 = arith.sitofp %14 : vector<8x1xi32> to vector<8x1xf32>
    %c0_2 = arith.constant 0 : index
    %c0_3 = arith.constant 0 : index
    %16 = vector.load %arg2[%c0_2, %c0_3] : memref<8x2xf32, #tpu.memory_space<vmem>>, vector<8x2xf32>
    %17 = vector.extract_strided_slice %16 {offsets = [0, 0], sizes = [8, 1], strides = [1, 1]} : vector<8x2xf32> to vector<8x1xf32>
    %18 = arith.subf %12, %17 : vector<8x1xf32>
    %19 = vector.extract_strided_slice %16 {offsets = [0, 1], sizes = [8, 1], strides = [1, 1]} : vector<8x2xf32> to vector<8x1xf32>
    %20 = arith.subf %15, %19 : vector<8x1xf32>
    %21 = arith.mulf %18, %18 : vector<8x1xf32>
    %22 = arith.mulf %20, %20 : vector<8x1xf32>
    %23 = arith.addf %21, %22 : vector<8x1xf32>
    %c8_i32 = arith.constant 8 : i32
    %24 = arith.muli %arg0, %c8_i32 : i32
    %25 = tpu.iota {dimensions = array<i32: 0>} : vector<8x1xi32>
    %26 = vector.broadcast %24 : i32 to vector<8x1xi32>
    %27 = arith.addi %26, %25 : vector<8x1xi32>
    %c16_i32 = arith.constant 16 : i32
    %28 = vector.broadcast %c16_i32 : i32 to vector<8x1xi32>
    %29 = arith.cmpi slt, %27, %28 : vector<8x1xi32>
    %30 = arith.extui %29 : vector<8x1xi1> to vector<8x1xi32>
    %31 = arith.sitofp %30 : vector<8x1xi32> to vector<8x1xf32>
    %cst_4 = arith.constant 4.000000e+00 : f32
    %32 = vector.broadcast %cst_4 : f32 to vector<8x1xf32>
    %33 = arith.cmpf olt, %23, %32 : vector<8x1xf32>
    %34 = arith.extui %33 : vector<8x1xi1> to vector<8x1xi32>
    %35 = arith.sitofp %34 : vector<8x1xi32> to vector<8x1xf32>
    %36 = arith.mulf %35, %31 : vector<8x1xf32>
    %37 = vector.shape_cast %36 : vector<8x1xf32> to vector<1x8x1xf32>
    %cst_5 = arith.constant dense<0.000000e+00> : vector<1xf32>
    %38 = vector.multi_reduction <add>, %37, %cst_5 [1, 2] : vector<1x8x1xf32> to vector<1xf32>
    %39 = vector.shape_cast %38 : vector<1xf32> to vector<1x1x1xf32>
    %40 = vector.extract %39[0, 0, 0] : f32 from vector<1x1x1xf32>
    %cst_6 = arith.constant 1.600000e+01 : f32
    %41 = vector.broadcast %cst_6 : f32 to vector<8x1xf32>
    %42 = arith.cmpf olt, %23, %41 : vector<8x1xf32>
    %43 = arith.extui %42 : vector<8x1xi1> to vector<8x1xi32>
    %44 = arith.sitofp %43 : vector<8x1xi32> to vector<8x1xf32>
    %45 = arith.mulf %44, %31 : vector<8x1xf32>
    %46 = vector.shape_cast %45 : vector<8x1xf32> to vector<1x8x1xf32>
    %cst_7 = arith.constant dense<0.000000e+00> : vector<1xf32>
    %47 = vector.multi_reduction <add>, %46, %cst_7 [1, 2] : vector<1x8x1xf32> to vector<1xf32>
    %48 = vector.shape_cast %47 : vector<1xf32> to vector<1x1x1xf32>
    %49 = vector.extract %48[0, 0, 0] : f32 from vector<1x1x1xf32>
    %cst_8 = arith.constant 6.400000e+01 : f32
    %50 = vector.broadcast %cst_8 : f32 to vector<8x1xf32>
    %51 = arith.cmpf olt, %23, %50 : vector<8x1xf32>
    %52 = arith.extui %51 : vector<8x1xi1> to vector<8x1xi32>
    %53 = arith.sitofp %52 : vector<8x1xi32> to vector<8x1xf32>
    %54 = arith.mulf %53, %31 : vector<8x1xf32>
    %55 = vector.shape_cast %54 : vector<8x1xf32> to vector<1x8x1xf32>
    %cst_9 = arith.constant dense<0.000000e+00> : vector<1xf32>
    %56 = vector.multi_reduction <add>, %55, %cst_9 [1, 2] : vector<1x8x1xf32> to vector<1xf32>
    %57 = vector.shape_cast %56 : vector<1xf32> to vector<1x1x1xf32>
    %58 = vector.extract %57[0, 0, 0] : f32 from vector<1x1x1xf32>
    %59 = tpu.iota {dimensions = array<i32: 0>} : vector<8x128xi32>
    %c0_i32 = arith.constant 0 : i32
    %60 = vector.broadcast %c0_i32 : i32 to vector<8x128xi32>
    %61 = arith.cmpi eq, %59, %60 : vector<8x128xi32>
    %c1_i32 = arith.constant 1 : i32
    %62 = vector.broadcast %c1_i32 : i32 to vector<8x128xi32>
    %63 = arith.cmpi eq, %59, %62 : vector<8x128xi32>
    %c2_i32 = arith.constant 2 : i32
    %64 = vector.broadcast %c2_i32 : i32 to vector<8x128xi32>
    %65 = arith.cmpi eq, %59, %64 : vector<8x128xi32>
    %cst_10 = arith.constant 0.000000e+00 : f32
    %66 = vector.broadcast %58 : f32 to vector<8x128xf32>
    %67 = vector.broadcast %cst_10 : f32 to vector<8x128xf32>
    %68 = arith.select %65, %66, %67 : vector<8x128xi1>, vector<8x128xf32>
    %69 = vector.broadcast %49 : f32 to vector<8x128xf32>
    %70 = arith.select %63, %69, %68 : vector<8x128xi1>, vector<8x128xf32>
    %71 = vector.broadcast %40 : f32 to vector<8x128xf32>
    %72 = arith.select %61, %71, %70 : vector<8x128xi1>, vector<8x128xf32>
    %c0_11 = arith.constant 0 : index
    %c0_12 = arith.constant 0 : index
    %c0_13 = arith.constant 0 : index
    %73 = vector.load %arg3[%c0_11, %c0_12, %c0_13] : memref<1x8x128xf32, #tpu.memory_space<vmem>>, vector<1x8x128xf32>
    %74 = vector.shape_cast %73 : vector<1x8x128xf32> to vector<8x128xf32>
    %75 = vector.shape_cast %72 : vector<8x128xf32> to vector<1x8x128xf32>
    tpu.vector_store %arg3[%c0_11, %c0_12, %c0_13], %75 {strides = array<i32>} : memref<1x8x128xf32, #tpu.memory_space<vmem>>, vector<1x8x128xf32>,
    return
  }
  func.func @transform_0(%arg0: i32) -> (i32, i32) {
    %c0_i32 = arith.constant 0 : i32
    %c0_i32_0 = arith.constant 0 : i32
    return %arg0, %c0_i32 : i32, i32
  }
  func.func @transform_1(%arg0: i32) -> (i32, i32) {
    %c0_i32 = arith.constant 0 : i32
    %c0_i32_0 = arith.constant 0 : i32
    return %arg0, %c0_i32 : i32, i32
  }
  func.func @transform_2(%arg0: i32) -> (i32, i32, i32) {
    %c0_i32 = arith.constant 0 : i32
    %c0_i32_0 = arith.constant 0 : i32
    %c0_i32_1 = arith.constant 0 : i32
    return %arg0, %c0_i32, %c0_i32_0 : i32, i32, i32
  }
}

</mosaic_0001>

<bundles_post_ra>
// kernel: tpu_custom_call.1
= control target key start
LH: loop header
LB: loop body
LE: loop exit
PB: predicated region body
PF: predicated region fallthrough
CT: control target
= control target key end

     0   :  { %7 = vsyncpa [#allocation3], 0  ;;  %s741_s0 = inlined_call_operand.hbm [shape: f32[16,256], index: 0, kind: input, shape index: {}]   ;;  %s742_s1 = inlined_call_operand.vmem [shape: f32[16,2], index: 1, kind: input, shape index: {}]   ;;  %s743_s2 = inlined_call_operand.hbm [shape: f32[2,8,128], index: 2, kind: output, shape index: {}]  }
   0x1   :  { %9 = vsyncpa [#allocation3 + $0x1], 0 }
   0x2   :  { %10 = vsyncpa [#allocation4], 0 }
   0x3   :  { %12 = vsyncpa [#allocation4 + $0x1], 0  ;;  %s567_s9 = smov 0   ;;  %s569_s10 = smov 0  }
   0x4   :  { %s571_s11 = smov 0   ;;  %s573_s12 = smov 0  }
   0x5 LB: > { %s588_s13 = sadd.s32 4294967295, %s546_s12   ;;  %s376_s14 = sadd.s32 4294967294, %s546_s12   ;;  %s546_s12 = sphi %s573_s12, %s758_s12   ;;  %s542_s11 = sphi %s571_s11, %s757_s11   ;;  %s538_s10 = sphi %s569_s10, %s756_s10   ;;  %s534_s9 = sphi %s567_s9, %s755_s9  }
   0x6   : > { %s592_s15 = sadd.s32 1, %s546_s12   ;;  %s25_s16 = sadd.s32 1, %s542_s11 }
   0x7   : > { %s22_s17 = ssub.s32 %s546_s12, %s592_s15  ;;  %p32_p0 = scmp.ne.s32.totalorder %s542_s11, %s538_s10 }
   0x8   : > { %p23_p1 = scmp.eq.s32.totalorder %s22_s17, 0  ;;  %p33_p2 = scmp.eq.s32.totalorder %s546_s12, 0 }
   0x9   : > { %p38_p3 = scmp.ne.s32.totalorder %s538_s10, %s534_s9  ;;  %p39_p4 = scmp.eq.s32.totalorder %s588_s13, 0 }
   0xa   : > { %s604_s18 = scalar_select %p23_p1, %s542_s11, %s25_s16  }
   0xb   : > { %p606_p5 = por %p33_p2, %p32_p0  ;;  %p610_p6 = por %p39_p4, %p38_p3 }
   0xc   : > { %p88_p7 = scmp.eq.s32.totalorder %s588_s13, 1  ;;  %p94_p8 = scmp.eq.s32.totalorder %s376_s14, 1 }
   0xd   : > { %p414_p10 = scmp.lt.s32.totalorder %s546_s12, 2  ;;  %s114_s23 = sand.u32 1, %s542_s11  }
   0xe   : > { %p617_p11 = por %p88_p7, %p32_p0  ;;  %p621_p12 = por %p94_p8, %p38_p3 }
   0xf   : > { %s395_s24 = sshll.u32 %s546_s12, 8  ;;  %s379_s25 = sshll.u32 %s114_s23, 4 }
  0x10   : > { %s747_s21 = scalar_select %p617_p11, 1, 0 }
  0x11   : > { %s748_s22 = scalar_select %p621_p12, 1, 0 }
  0x12   : > { %s630_s28 = scalar_lea.hbm %s741_s0, %s395_s24  ;;  %s118_s29 = scalar_lea.vmem [#allocation2], %s379_s25 }
  0x13   : > { %s126_s30 = sshll.u32 %s118_s29, 4  ;;  %p634_p13 = pnand %p414_p10, %p606_p5  ;;  %s638_s30 = int_to_ptr.vmem [resolvable:$true] %s126_s30 }
  0x14   : > { %s115_s4 = scalar_lea.sflag [#allocation3], %s114_s23  ;;  %s450_s5 = scalar_lea.hbm %s630_s28, 256 }
  0x15   : > { %p451_p2 = scmp.ne.s32.totalorder %s630_s28, %s450_s5  ;;  %p452_p3 = pneg %p634_p13 }
  0x16   : > { %s455_s8 = scalar_lea.hbm %s741_s0, 512  ;;  %p456_p5 = scmp.lt.u32.totalorder %s630_s28, %s741_s0 }
  0x17   : > { %p453_p4 = pnand %p452_p3, %p451_p2  ;;  %p457_p8 = scmp.lt.u32.totalorder %s455_s8, %s450_s5 }
  0x18   : > { %p459_p9 = scmp.lt.u32.totalorder %s450_s5, %s630_s28 }
  0x19   : > { %p454_p7 = pneg %p453_p4  ;;  %p458_p10 = por %p457_p8, %p456_p5 }
  0x1b   : > { %p460_p0 = por %p459_p9, %p458_p10 }
  0x1d   : > { %p461_p1 = pnand %p460_p0, %p454_p7 }
  0x1f   : > { %464 = shalt.err (!%p461_p1)
}
  0x20   : > { %s465_s17 = scalar_lea.vmem %s638_s30, 256  ;;  %s548_s19 = smov [#allocation2]  }
  0x21   : > { %p466_p2 = scmp.ne.s32.totalorder %s638_s30, %s465_s17  ;;  %s470_s23 = sshll.u32 %s548_s19, 4  ;;  %s471_s23 = int_to_ptr.vmem [resolvable:$false] %s470_s23 }
  0x22   : > { %s472_s24 = scalar_lea.vmem %s471_s23, 512  ;;  %p473_p11 = scmp.lt.s32.totalorder %s638_s30, %s471_s23 }
  0x23   : > { %p468_p4 = pnand %p466_p2, %p452_p3  ;;  %p474_p5 = scmp.lt.s32.totalorder %s472_s24, %s465_s17 }
  0x25   : > { %p469_p12 = pneg %p468_p4  ;;  %p475_p8 = por %p474_p5, %p473_p11 }
  0x27   : > { %p476_p9 = pnand %p475_p8, %p469_p12 }
  0x29   : > { %479 = shalt.err (!%p476_p9)
}
  0x2a   : > { %409 = dma.hbm_to_vmem [thread:$0]  (!%p634_p13), %s630_s28, 256, %s638_s30, %s115_s4  }
  0x2b   : > { %p750_p0 = scmp.lt.s32.totalorder %s546_s12, 3  ;;  %p751_p1 = scmp.ge.s32.totalorder %s546_s12, 1 }
  0x2d   : > { %p139_p3 = pnand %p751_p1, %p750_p0 }
  0x2e   : > { %s672_s25 = sand.u32 (!%p139_p3), 1, %s538_s10  }
  0x2f   : > { %142 = sbr.rel (%p139_p3) target bundleno = 858 (0x35a), region = 28  ;;  %s383_s26 = sshll.u32 (!%p139_p3), %s672_s25, 4 }
  0x30   : > { %s145_s27 = scalar_lea.sflag (!%p139_p3), [#allocation3], %s672_s25  ;;  %s148_s29 = scalar_lea.vmem (!%p139_p3), [#allocation2], %s383_s26 }
  0x36   : > { %525 = dma.done.wait (%p610_p6), %s145_s27, 256  }
  0x37   : > { %527 = vsyncadd (%p610_p6), %s145_s27, 4294967040  ;;  %v177_v0 = vld [vmem:[%s148_s29] sm:$0xff]  ;;  %v178_v1 = vld [vmem:[%s148_s29 + $0x8] sm:$0xff]  ;;  %v182_v3 = vlaneseq  ;;  %p173_p6 = scmp.lt.s32.totalorder %s588_s13, 1  ;;  %s549_s5 = smov 127   ;;  %v550_v35 = vmov 0.0  }
  0x38   : > { %v179_v2 = vmax.f32 %v177_v0, %v178_v1  ;;  %s386_s6 = sshll.u32 %s588_s13, 3  ;;  %vm231_vm7 = vcmask 7168   ;;  %s384_s7 = sshll.u32 %s672_s25, 3 }
  0x39   : > { %v183_v4 = vand.u32 127, %v182_v3  ;;  %s174_s20 = scalar_select %p173_p6, %s588_s13, 1  ;;  %v686_v29 = vshrl.u32 %v182_v3, 7  ;;  %v222_v30 = vstv %s386_s6 }
  0x3a   : > { %180 = vmax.xlane.f32.xlu0 %v179_v2  ;;  %s392_s16 = sshll.u32 %s588_s13, 7  ;;  %s172_s19 = scalar_lea.vmem [#allocation5], %s384_s7 }
  0x3b   : > { %v184_v5 = vadd.s32 128, %v183_v4  ;;  %s385_s28 = sshll.u32 %s174_s20, 3  ;;  %v223_v31 = vadd.s32 %v222_v30, %v686_v29  ;;  %vm272_vm9 = vcmp.eq.s32.totalorder %v686_v29, 2  ;;  %vm271_vm10 = vcmp.eq.s32.totalorder %v686_v29, 1  ;;  %s294_s23 = sshll.u32 %s172_s19, 4  ;;  %s699_s23 = int_to_ptr.vmem [resolvable:$true] %s294_s23 }
  0x3c   : > { %s176_s4 = scalar_lea.vmem %s742_s1, %s385_s28  ;;  %vm270_vm11 = vcmp.eq.s32.totalorder %v686_v29, 0  ;;  %s697_s27 = scalar_lea.hbm %s743_s2, %s392_s16 }
  0x3d   : > { %v209_v23 = vld [vmem:[%s176_s4] sm:$0xff]  ;;  %vm224_vm4 = vcmp.lt.s32.totalorder %v223_v31, 16  ;;  %s281_s13 = scalar_lea.sflag [#allocation4], %s672_s25  ;;  %s480_s29 = scalar_lea.vmem %s699_s23, 128 }
  0x3e   : > { %v387_v36 = vsel %vm224_vm4, 1.0, %v550_v35  ;;  %p481_p11 = scmp.ne.s32.totalorder %s699_s23, %s480_s29  ;;  %p752_p12 = scmp.ne.s32.totalorder %s747_s21, 0 }
  0x3f   : > { %s551_s20 = smov [#allocation5]  }
  0x40   : > { %p482_p13 = pnand %p481_p11, %p752_p12  ;;  %s484_s28 = sshll.u32 %s551_s20, 4  ;;  %s485_s28 = int_to_ptr.vmem [resolvable:$false] %s484_s28 }
  0x41   : > { %s486_s30 = scalar_lea.vmem %s485_s28, 256  ;;  %p487_p10 = scmp.lt.s32.totalorder %s699_s23, %s485_s28 }
  0x42   : > { %p483_p7 = pneg %p482_p13  ;;  %p488_p2 = scmp.lt.s32.totalorder %s486_s30, %s480_s29 }
  0x44   : > { %p489_p4 = por %p488_p2, %p487_p10 }
  0x46   : > { %p490_p5 = pnand %p489_p4, %p483_p7 }
  0xc7   : > { %v181_v6 = vpop.xlane.xlu0 %180 }
  0xc8   : > { %vm185_vm0 = vcmp.eq.f32.partialorder %v177_v0, %v181_v6  ;;  %vm186_vm1 = vcmp.eq.f32.partialorder %v178_v1, %v181_v6 }
  0xc9   : > { %v187_v7 = vsel %vm185_vm0, %v183_v4, 256  ;;  %v188_v8 = vsel %vm186_vm1, %v184_v5, 256 }
  0xca   : > { %vm189_vm2 = vcmp.lt.s32.totalorder %v187_v7, %v188_v8 }
  0xcb   : > { %v190_v9 = vsel %vm189_vm2, %v187_v7, %v188_v8 }
  0xcc   : > { %v192_v10 = vshra.s32 %v190_v9, 16  ;;  %v191_v12 = vand.u32 65535, %v190_v9 }
  0xce   : > { %v194_v11 = vcvt.s32.f32 %v192_v10  ;;  %v193_v14 = vcvt.s32.f32 %v191_v12 }
  0xd0   : > { %195 = vmin.xlane.f32.xlu0 %v194_v11 }
 0x15d   : > { %v196_v13 = vpop.xlane.xlu0 %195 }
 0x15e   : > { %vm197_vm3 = vcmp.eq.f32.partialorder %v194_v11, %v196_v13  ;;  %v202_v16 = vcvt.f32.s32 %v196_v13 }
 0x15f   : > { %v198_v15 = vsel %vm197_vm3, %v193_v14, inf }
 0x160   : > { %199 = vmin.xlane.f32.xlu1 %v198_v15  ;;  %v203_v18 = vshll.u32 %v202_v16, 16 }
 0x1ed   : > { %v200_v17 = vpop.xlane.xlu1 %199 }
 0x1ee   : > { %v201_v19 = vcvt.f32.s32 %v200_v17 }
 0x1f0   : > { %v204_v20 = vadd.s32 %v203_v18, %v201_v19 }
 0x1f2   : > { %v205_v21 = vand.u32 15, %v204_v20  ;;  %v207_v22 = vshra.s32 %v204_v20, 4 }
 0x1f4   : > { %v208_v24 = vcvt.s32.f32 %v207_v22  ;;  %v206_v25 = vcvt.s32.f32 %v205_v21 }
 0x1f6   : > { %v211_v26 = vsub.f32 %v208_v24, %v209_v23  ;;  %v210_v27 = vsub.f32 %v206_v25, %v209_v23 }
 0x1f8   : > { %v213_v28 = vmul.f32 %v211_v26, %v211_v26  ;;  %v212_v32 = vmul.f32 %v210_v27, %v210_v27 }
 0x1fa   : > { %215 = vrot.lane.b32.xlu1 %v213_v28, %s549_s5 }
 0x26c   : > { %v216_v33 = vpop.permute.xlu1 %215 }
 0x26d   : > { %v218_v34 = vadd.f32 %v216_v33, %v212_v32 }
 0x26f   : > { %vm227_vm5 = vcmp.lt.f32.partialorder %v218_v34, 4.0  ;;  %vm242_vm6 = vcmp.lt.f32.partialorder %v218_v34, 16.0  ;;  %vm256_vm8 = vcmp.lt.f32.partialorder %v218_v34, 64.0 }
 0x270   : > { %v388_v37 = vsel %vm227_vm5, 1.0, %v550_v35  ;;  %v389_v38 = vsel %vm242_vm6, 1.0, %v550_v35  ;;  %v390_v42 = vsel %vm256_vm8, 1.0, %v550_v35 }
 0x271   : > { %v230_v39 = vmul.f32 %v388_v37, %v387_v36  ;;  %v245_v41 = vmul.f32 %v389_v38, %v387_v36  ;;  %v259_v44 = vmul.f32 %v390_v42, %v387_v36 }
 0x273   : > { %v232_v40 = vsel %vm231_vm7, %v230_v39, 0.0  ;;  %v246_v43 = vsel %vm231_vm7, %v245_v41, 0.0  ;;  %v260_v45 = vsel %vm231_vm7, %v259_v44, 0.0 }
 0x274   : > { %233 = vadd.xlane.f32.xlu0 %v232_v40 }
 0x278   : > { %247 = vadd.xlane.f32.xlu0 %v246_v43 }
 0x27c   : > { %261 = vadd.xlane.f32.xlu0 %v260_v45 }
 0x301   : > { %v234_v46 = vpop.xlane.xlu0 %233 }
 0x302   : > { %v235_v47 = vrot.slane %v234_v46, 4 }
 0x304   : > { %v236_v48 = vadd.f32 %v235_v47, %v234_v46 }
 0x305   : > { %v248_v49 = vpop.xlane.xlu0 %247 }
 0x306   : > { %v237_v50 = vrot.slane %v236_v48, 2  ;;  %v249_v51 = vrot.slane %v248_v49, 4 }
 0x308   : > { %v250_v52 = vadd.f32 %v249_v51, %v248_v49  ;;  %v238_v53 = vadd.f32 %v237_v50, %v236_v48 }
 0x309   : > { %v262_v54 = vpop.xlane.xlu0 %261 }
 0x30a   : > { %v251_v55 = vrot.slane %v250_v52, 2  ;;  %v263_v56 = vrot.slane %v262_v54, 4  ;;  %v239_v57 = vrot.slane %v238_v53, 1 }
 0x30c   : > { %v264_v58 = vadd.f32 %v263_v56, %v262_v54  ;;  %v240_v59 = vadd.f32 %v239_v57, %v238_v53  ;;  %v252_v60 = vadd.f32 %v251_v55, %v250_v52 }
 0x30e   : > { %v265_v61 = vrot.slane %v264_v58, 2  ;;  %396 = vpush %v240_v59  ;;  %v253_v62 = vrot.slane %v252_v60, 1 }
 0x310   : > { %v266_v63 = vadd.f32 %v265_v61, %v264_v58  ;;  %v254_v0 = vadd.f32 %v253_v62, %v252_v60 }
 0x312   : > { %398 = vpush %v254_v0  ;;  %v267_v1 = vrot.slane %v266_v63, 1 }
 0x314   : > { %v268_v2 = vadd.f32 %v267_v1, %v266_v63 }
 0x316   : > { %400 = vpush %v268_v2 }
 0x33f   : > { %s397_s8 = spop %396 }
 0x340   : > { %v277_v6 = vstv %s397_s8 }
 0x343   : > { %s399_s14 = spop %398 }
 0x344   : > { %v275_v4 = vstv %s399_s14 }
 0x347   : > { %s401_s17 = spop %400 }
 0x348   : > { %v273_v3 = vstv %s401_s17 }
 0x349   : > { %v274_v5 = vsel %vm272_vm9, %v273_v3, 0.0 }
 0x34a   : > { %v276_v7 = vsel %vm271_vm10, %v275_v4, %v274_v5 }
 0x34b   : > { %v278_v8 = vsel %vm270_vm11, %v277_v6, %v276_v7 }
 0x34c   : > { %279 = vst [vmem:[%s172_s19] sm:$0xff] %v278_v8 }
 0x34d   : > { %493 = shalt.err (!%p490_p5)
}
 0x34e   : > { %s494_s25 = scalar_lea.hbm %s697_s27, 128  ;;  %s498_s5 = scalar_lea.hbm %s743_s2, 256 }
 0x34f   : > { %p495_p8 = scmp.ne.s32.totalorder %s697_s27, %s494_s25  ;;  %p499_p1 = scmp.lt.u32.totalorder %s697_s27, %s743_s2 }
 0x350   : > { %p500_p3 = scmp.lt.u32.totalorder %s498_s5, %s494_s25  ;;  %p502_p11 = scmp.lt.u32.totalorder %s494_s25, %s697_s27 }
 0x351   : > { %p496_p9 = pnand %p495_p8, %p752_p12 }
 0x352   : > { %p501_p6 = por %p500_p3, %p499_p1 }
 0x353   : > { %p497_p0 = pneg %p496_p9 }
 0x354   : > { %p503_p13 = por %p502_p11, %p501_p6 }
 0x356   : > { %p504_p7 = pnand %p503_p13, %p497_p0 }
 0x358   : > { %507 = shalt.err (!%p504_p7)
}
 0x359   : > { %404 = dma.vmem_to_hbm [thread:$0]  (%p752_p12), %s699_s23, 128, %s697_s27, %s281_s13  }
 0x35a PF: > { %s306_s8 = sand.u32 1, %s534_s9   ;;  %p753_p10 = scmp.ne.s32.totalorder %s748_s22, 0 }
 0x35b   : > { %p754_p2 = scmp.ge.s32.totalorder %s546_s12, 2  ;;  %s307_s14 = scalar_lea.sflag [#allocation4], %s306_s8 }
 0x35d   : > { %p411_p4 = pnand %p754_p2, %p753_p10 }
 0x35f   : > { %529 = dma.done.wait (!%p411_p4), %s307_s14, 128  }
 0x360   : > { %531 = vsyncadd (!%p411_p4), %s307_s14, 4294967168  ;;  %p15_p5 = scmp.ge.s32.totalorder %s592_s15, 4   ;;  %s755_s9 = smov %s538_s10 }
 0x361   : > { %s756_s10 = smov %s542_s11  ;;  %s757_s11 = smov %s604_s18 }
 0x362   : > { %s758_s12 = smov %s592_s15  ;;  %17 = sbr.rel (!%p15_p5) target bundleno = 5 (0x5), region = 76 }
 0x369   :  { %312 = vsyncpa [#allocation3], 1 }
 0x36a   :  { %314 = vsyncpa [#allocation3 + $0x1], 1 }
 0x36b   :  { %315 = vsyncpa [#allocation4], 1 }
 0x36c   :  { %317 = vsyncpa [#allocation4 + $0x1], 1 }

</bundles_post_ra>
